<compile_context>
chip_gen: v5e
topology: v5e:2x2
jax: 0.10.0
libtpu: 0.0.40
codegen_flags: <defaults>
</compile_context>

<pallas_src>
import functools

import numpy as np
import jax
import jax.numpy as jnp
from jax.experimental import pallas as pl
from jax.experimental.pallas import tpu as pltpu


# ---------------------------------------------------------------------------
# Fused ResNet-block kernel (conv1+BN+ReLU -> conv2+BN -> (+identity) -> ReLU)
# ---------------------------------------------------------------------------
def _resnet_block_kernel(x_ref, t1_ref, t2_ref, gamma_ref, beta_ref, pool_ref,
                         td_ref, bd_ref, o_ref, *,
                         kernel, stride, pad, eps, downsample,
                         n, ho, wo, cout):
    nho = n * ho
    woc = wo * cout
    inv_m = 1.0 / (n * ho * wo)

    def row_band(ref, r0, s):
        # (n*ho, row_width): ho H-rows (stride s, starting at padded row r0) of
        # an H-padded, (W,C)-flattened activation ref.  Leading-dim reshape
        # only -- no relayout, no per-tap cast (ref is already bf16).
        if s == 1:
            band = ref[:, r0:r0 + ho, :]
        else:
            band = ref[:, pl.ds(r0, ho, s), :]
        return band.reshape(nho, ref.shape[-1])

    def batchnorm(z, relu):
        # Train-mode BatchNorm2d, computed and applied in the lane-dense
        # (n*ho, wo*cout) layout.  Per-channel batch stats are pooled over the
        # wo sub-columns and broadcast back in one shot with the (woc, woc)
        # channel-pooling projector on the MXU (huge slack), so no narrow
        # (·, cout) reductions or reshapes are needed.
        colsum = jnp.sum(z, axis=0, keepdims=True)                     # (1,woc)
        mean_b = jnp.dot(colsum, pool_ref[...],
                         preferred_element_type=jnp.float32) * inv_m
        cz = z - mean_b
        var_b = jnp.dot(jnp.sum(cz * cz, axis=0, keepdims=True), pool_ref[...],
                        preferred_element_type=jnp.float32) * inv_m
        y = cz * jax.lax.rsqrt(var_b + eps) * gamma_ref[...] + beta_ref[...]
        return jnp.maximum(y, 0.0) if relu else y

    # ---- conv1: one width-Toeplitz GEMM per kh tap, then BN + ReLU ---------
    # (conv bias omitted: cancelled exactly by the batch-stat mean subtraction)
    acc = jnp.zeros((nho, woc), jnp.float32)
    for kh in range(kernel):
        acc = acc + jnp.dot(row_band(x_ref, kh, stride), t1_ref[kh],
                            preferred_element_type=jnp.float32)
    y1 = batchnorm(acc, relu=True)

    # ---- conv2: height shift via zero-row concat (no padded scratch, no
    #      whole-map zeroing); width zero-padding is folded into t2 ----------
    y1b = y1.astype(jnp.bfloat16).reshape(n, ho, woc)      # single bf16 cast
    acc = jnp.zeros((nho, woc), jnp.float32)
    for kh in range(kernel):
        top = max(0, pad - kh)          # zero rows above (H zero-padding)
        bot = max(0, kh - pad)          # zero rows below
        parts = []
        if top:
            parts.append(jnp.zeros((n, top, woc), jnp.bfloat16))
        parts.append(y1b[:, bot:ho - top, :])
        if bot:
            parts.append(jnp.zeros((n, bot, woc), jnp.bfloat16))
        band = parts[0] if len(parts) == 1 else jnp.concatenate(parts, axis=1)
        acc = acc + jnp.dot(band.reshape(nho, woc), t2_ref[kh],
                            preferred_element_type=jnp.float32)
    y2 = batchnorm(acc, relu=False)

    # ---- identity / 1x1 downsample path -------------------------------------
    if downsample:
        ident = jnp.dot(row_band(x_ref, pad, stride), td_ref[...],
                        preferred_element_type=jnp.float32) + bd_ref[...]
    else:
        # identity = x itself (requires Cin == Cout, stride == 1); the skip is
        # the single-cast bf16 copy of x -- quantization << test tolerance.
        ident = row_band(x_ref, pad, 1).astype(jnp.float32)

    # ---- relu(identity + y2): lane-dense (n*ho, wo*cout) full-width store ----
    o_ref[...] = jnp.maximum(ident + y2, 0.0)


# ---------------------------------------------------------------------------
# Host-side weight restructuring (free layout plumbing)
# ---------------------------------------------------------------------------
def _width_toeplitz(w_hwio, wi, wo, stride, pad):
    """(K, wi*Cin, wo*Cout) block-Toeplitz matrices: the width dimension of a
    2-D conv (incl. its zero width-padding) realized as one GEMM per kh tap."""
    k, _, cin, cout = w_hwio.shape
    t = np.zeros((k, wi * cin, wo * cout), np.float32)
    w_np = np.asarray(w_hwio, np.float32)
    for kh in range(k):
        for w in range(wo):
            for kw in range(k):
                j = w * stride + kw - pad
                if 0 <= j < wi:
                    t[kh, j * cin:(j + 1) * cin,
                      w * cout:(w + 1) * cout] = w_np[kh, kw]
    return t


def _downsample_toeplitz(wd_11io, wi, cin, wo, cout, stride):
    """(wi*Cin, wo*Cout) matrix realizing the strided 1x1 downsample conv."""
    t = np.zeros((wi * cin, wo * cout), np.float32)
    wd = np.asarray(wd_11io, np.float32).reshape(cin, cout)
    for w in range(wo):
        j = w * stride
        t[j * cin:(j + 1) * cin, w * cout:(w + 1) * cout] = wd
    return t


# ---------------------------------------------------------------------------
# Public wrapper (layout plumbing only)
# ---------------------------------------------------------------------------
def resnet_layer_forward(x_nchw, params, *, kernel=3, stride=1,
                         downsample=False, eps=1e-5):
    n, cin, h, w = x_nchw.shape
    cout = params["w1"].shape[-1]
    pad = 1                                    # nn.Conv2d(..., padding=1)
    ho = (h + 2 * pad - kernel) // stride + 1
    wo = (w + 2 * pad - kernel) // stride + 1
    nho, woc = n * ho, wo * cout

    if not downsample:
        assert cin == cout and stride == 1 and wo == w, \
            "identity path requires Cin == Cout and stride == 1"

    # NCHW -> H-padded, (W,C)-flattened, bf16 (activations cast exactly once;
    # width padding is folded into the Toeplitz weights instead).
    x = jnp.transpose(x_nchw, (0, 2, 3, 1))
    x = jnp.pad(x, ((0, 0), (pad, pad), (0, 0), (0, 0)))
    x = x.reshape(n, h + 2 * pad, w * cin).astype(jnp.bfloat16)

    t1 = jnp.asarray(_width_toeplitz(np.asarray(params["w1"]), w, wo, stride, pad),
                     jnp.bfloat16)
    t2 = jnp.asarray(_width_toeplitz(np.asarray(params["w2"]), wo, wo, 1, pad),
                     jnp.bfloat16)
    gamma_t = jnp.tile(jnp.asarray(params["gamma"], jnp.float32), wo).reshape(1, woc)
    beta_t = jnp.tile(jnp.asarray(params["beta"], jnp.float32), wo).reshape(1, woc)
    # channel-pooling projector: pool[w*C+c, w'*C+c'] = (c == c')
    pool = jnp.asarray(np.tile(np.eye(cout, dtype=np.float32), (wo, wo)))

    if downsample:
        td = jnp.asarray(_downsample_toeplitz(np.asarray(params["wd"]),
                                              w, cin, wo, cout, stride),
                         jnp.bfloat16)
        bd_t = jnp.tile(jnp.asarray(params["bd"], jnp.float32), wo).reshape(1, woc)
    else:                                       # unused by the kernel
        td = jnp.zeros((w * cin, woc), jnp.bfloat16)
        bd_t = jnp.zeros((1, woc), jnp.float32)

    kern = functools.partial(
        _resnet_block_kernel, kernel=kernel, stride=stride, pad=pad, eps=eps,
        downsample=downsample, n=n, ho=ho, wo=wo, cout=cout)

    out = pl.pallas_call(
        kern,
        out_shape=jax.ShapeDtypeStruct((nho, woc), jnp.float32),
    )(x, t1, t2, gamma_t, beta_t, pool, td, bd_t)

    return jnp.transpose(out.reshape(n, ho, wo, cout), (0, 3, 1, 2))


# ---------------------------------------------------------------------------
# Pure-JAX f32 reference (keeps the conv biases the kernel drops)
# ---------------------------------------------------------------------------
def _ref_forward(x_nchw, params, *, stride=1, downsample=False, eps=1e-5):
    def conv(x, w_hwio, b, s, p):
        w = jnp.transpose(w_hwio, (3, 2, 0, 1))  # OIHW
        y = jax.lax.conv_general_dilated(
            x, w, (s, s), [(p, p), (p, p)],
            dimension_numbers=("NCHW", "OIHW", "NCHW"))
        return y + b.reshape(1, -1, 1, 1)

    def bn(x, g, bta):
        mean = jnp.mean(x, axis=(0, 2, 3), keepdims=True)
        var = jnp.mean((x - mean) ** 2, axis=(0, 2, 3), keepdims=True)
        return (x - mean) * jax.lax.rsqrt(var + eps) * g.reshape(1, -1, 1, 1) \
            + bta.reshape(1, -1, 1, 1)

    ident = x_nchw
    y = jax.nn.relu(bn(conv(x_nchw, params["w1"], params["b1"], stride, 1),
                       params["gamma"], params["beta"]))
    y = bn(conv(y, params["w2"], params["b2"], 1, 1),
           params["gamma"], params["beta"])
    if downsample:
        ident = conv(ident, params["wd"], params["bd"], stride, 0)
    return jax.nn.relu(ident + y)


# ---------------------------------------------------------------------------
# Main
# ---------------------------------------------------------------------------
if __name__ == "__main__":
    # _ResnetLayer(in_channel=4, out_channel=8, kernel=3, stride=1,
    #              padding=1, downsample=True)
    N, Cin, Cout, H, W, K = 2, 4, 8, 16, 16, 3
    stride, downsample = 1, True

    key = jax.random.PRNGKey(0)
    k1, k2, k3, k4, k5, k6, kx = jax.random.split(key, 7)

    params = {
        "w1": 0.1 * jax.random.normal(k1, (K, K, Cin, Cout), jnp.float32),  # HWIO
        "b1": 0.1 * jax.random.normal(k2, (Cout,), jnp.float32),  # reference only
        "w2": 0.1 * jax.random.normal(k3, (K, K, Cout, Cout), jnp.float32),
        "b2": 0.1 * jax.random.normal(k4, (Cout,), jnp.float32),  # reference only
        "gamma": jnp.ones((Cout,), jnp.float32),                  # BN init
        "beta": jnp.zeros((Cout,), jnp.float32),
        "wd": 0.1 * jax.random.normal(k5, (1, 1, Cin, Cout), jnp.float32),
        "bd": 0.1 * jax.random.normal(k6, (Cout,), jnp.float32),
    }
    # TODO(synk): BatchNorm running-mean/var buffer updates are training-time
    # side effects; the returned tensor does not depend on them in train mode,
    # so they are not materialized.

    x = jax.random.normal(kx, (N, Cin, H, W), jnp.float32)

    out = resnet_layer_forward(
        x, params, kernel=K, stride=stride, downsample=downsample)
    out = jax.block_until_ready(out)

    ref = _ref_forward(x, params, stride=stride, downsample=downsample)
    assert out.shape == ref.shape == (N, Cout, H, W)
    err = jnp.abs(out - ref)
    # bf16 MXU operands (f32 accumulation) vs f32 reference: O(1e-2) max error.
    assert float(jnp.max(err)) < 5e-2, "max-abs mismatch vs reference"
    assert float(jnp.mean(err)) < 1e-2, "mean-abs mismatch vs reference"

    print("KERNEL_OK")
</pallas_src>

<mosaic_0001>
module attributes {stable_mosaic.version = 11 : i64} {
  func.func @_resnet_block_kernel(%arg0: memref<2x18x64xbf16, #tpu.memory_space<vmem>>, %arg1: memref<3x64x128xbf16, #tpu.memory_space<vmem>>, %arg2: memref<3x128x128xbf16, #tpu.memory_space<vmem>>, %arg3: memref<1x128xf32, #tpu.memory_space<vmem>>, %arg4: memref<1x128xf32, #tpu.memory_space<vmem>>, %arg5: memref<128x128xf32, #tpu.memory_space<vmem>>, %arg6: memref<64x128xbf16, #tpu.memory_space<vmem>>, %arg7: memref<1x128xf32, #tpu.memory_space<vmem>>, %arg8: memref<32x128xf32, #tpu.memory_space<vmem>>) attributes {dimension_semantics = [], scalar_prefetch = 0 : i64, scratch_operands = 0 : i64, tpu.core_type = #tpu.core_type<tc>} {
    %cst = arith.constant 0.000000e+00 : f32
    %0 = vector.broadcast %cst : f32 to vector<32x128xf32>
    %c0 = arith.constant 0 : index
    %c0_0 = arith.constant 0 : index
    %c0_1 = arith.constant 0 : index
    %1 = vector.load %arg0[%c0, %c0_0, %c0_1] : memref<2x18x64xbf16, #tpu.memory_space<vmem>>, vector<2x16x64xbf16>
    %2 = vector.shape_cast %1 : vector<2x16x64xbf16> to vector<32x64xbf16>
    %c0_2 = arith.constant 0 : index
    %c0_3 = arith.constant 0 : index
    %c0_4 = arith.constant 0 : index
    %3 = vector.load %arg1[%c0_2, %c0_3, %c0_4] : memref<3x64x128xbf16, #tpu.memory_space<vmem>>, vector<1x64x128xbf16>
    %4 = vector.shape_cast %3 : vector<1x64x128xbf16> to vector<64x128xbf16>
    %cst_5 = arith.constant dense<0.000000e+00> : vector<32x128xf32>
    %5 = tpu.matmul %2, %4, %cst_5 {dimension_numbers = #tpu.dot_dimension_numbers<[1], [0], [0], [1], [0, 0, 1, 1], [], []>} : vector<32x64xbf16>, vector<64x128xbf16>, vector<32x128xf32> -> vector<32x128xf32>
    %6 = arith.addf %0, %5 : vector<32x128xf32>
    %c0_6 = arith.constant 0 : index
    %c1 = arith.constant 1 : index
    %c0_7 = arith.constant 0 : index
    %7 = vector.load %arg0[%c0_6, %c1, %c0_7] : memref<2x18x64xbf16, #tpu.memory_space<vmem>>, vector<2x16x64xbf16>
    %8 = vector.shape_cast %7 : vector<2x16x64xbf16> to vector<32x64xbf16>
    %c1_8 = arith.constant 1 : index
    %c0_9 = arith.constant 0 : index
    %c0_10 = arith.constant 0 : index
    %9 = vector.load %arg1[%c1_8, %c0_9, %c0_10] : memref<3x64x128xbf16, #tpu.memory_space<vmem>>, vector<1x64x128xbf16>
    %10 = vector.shape_cast %9 : vector<1x64x128xbf16> to vector<64x128xbf16>
    %cst_11 = arith.constant dense<0.000000e+00> : vector<32x128xf32>
    %11 = tpu.matmul %8, %10, %cst_11 {dimension_numbers = #tpu.dot_dimension_numbers<[1], [0], [0], [1], [0, 0, 1, 1], [], []>} : vector<32x64xbf16>, vector<64x128xbf16>, vector<32x128xf32> -> vector<32x128xf32>
    %12 = arith.addf %6, %11 : vector<32x128xf32>
    %c0_12 = arith.constant 0 : index
    %c2 = arith.constant 2 : index
    %c0_13 = arith.constant 0 : index
    %13 = vector.load %arg0[%c0_12, %c2, %c0_13] : memref<2x18x64xbf16, #tpu.memory_space<vmem>>, vector<2x16x64xbf16>
    %14 = vector.shape_cast %13 : vector<2x16x64xbf16> to vector<32x64xbf16>
    %c2_14 = arith.constant 2 : index
    %c0_15 = arith.constant 0 : index
    %c0_16 = arith.constant 0 : index
    %15 = vector.load %arg1[%c2_14, %c0_15, %c0_16] : memref<3x64x128xbf16, #tpu.memory_space<vmem>>, vector<1x64x128xbf16>
    %16 = vector.shape_cast %15 : vector<1x64x128xbf16> to vector<64x128xbf16>
    %cst_17 = arith.constant dense<0.000000e+00> : vector<32x128xf32>
    %17 = tpu.matmul %14, %16, %cst_17 {dimension_numbers = #tpu.dot_dimension_numbers<[1], [0], [0], [1], [0, 0, 1, 1], [], []>} : vector<32x64xbf16>, vector<64x128xbf16>, vector<32x128xf32> -> vector<32x128xf32>
    %18 = arith.addf %12, %17 : vector<32x128xf32>
    %cst_18 = arith.constant dense<0.000000e+00> : vector<128xf32>
    %19 = vector.multi_reduction <add>, %18, %cst_18 [0] : vector<32x128xf32> to vector<128xf32>
    %20 = vector.shape_cast %19 : vector<128xf32> to vector<1x128xf32>
    %c0_19 = arith.constant 0 : index
    %c0_20 = arith.constant 0 : index
    %21 = vector.load %arg5[%c0_19, %c0_20] : memref<128x128xf32, #tpu.memory_space<vmem>>, vector<128x128xf32>
    %cst_21 = arith.constant dense<0.000000e+00> : vector<1x128xf32>
    %22 = tpu.matmul %20, %21, %cst_21 {dimension_numbers = #tpu.dot_dimension_numbers<[1], [0], [0], [1], [0, 0, 1, 1], [], []>} : vector<1x128xf32>, vector<128x128xf32>, vector<1x128xf32> -> vector<1x128xf32>
    %cst_22 = arith.constant 0.001953125 : f32
    %23 = vector.broadcast %cst_22 : f32 to vector<1x128xf32>
    %24 = arith.mulf %22, %23 : vector<1x128xf32>
    %25 = vector.broadcast %24 : vector<1x128xf32> to vector<32x128xf32>
    %26 = arith.subf %18, %25 : vector<32x128xf32>
    %27 = arith.mulf %26, %26 : vector<32x128xf32>
    %cst_23 = arith.constant dense<0.000000e+00> : vector<128xf32>
    %28 = vector.multi_reduction <add>, %27, %cst_23 [0] : vector<32x128xf32> to vector<128xf32>
    %29 = vector.shape_cast %28 : vector<128xf32> to vector<1x128xf32>
    %c0_24 = arith.constant 0 : index
    %c0_25 = arith.constant 0 : index
    %30 = vector.load %arg5[%c0_24, %c0_25] : memref<128x128xf32, #tpu.memory_space<vmem>>, vector<128x128xf32>
    %cst_26 = arith.constant dense<0.000000e+00> : vector<1x128xf32>
    %31 = tpu.matmul %29, %30, %cst_26 {dimension_numbers = #tpu.dot_dimension_numbers<[1], [0], [0], [1], [0, 0, 1, 1], [], []>} : vector<1x128xf32>, vector<128x128xf32>, vector<1x128xf32> -> vector<1x128xf32>
    %cst_27 = arith.constant 0.001953125 : f32
    %32 = vector.broadcast %cst_27 : f32 to vector<1x128xf32>
    %33 = arith.mulf %31, %32 : vector<1x128xf32>
    %cst_28 = arith.constant 9.99999974E-6 : f32
    %34 = vector.broadcast %cst_28 : f32 to vector<1x128xf32>
    %35 = arith.addf %33, %34 : vector<1x128xf32>
    %36 = math.rsqrt %35 : vector<1x128xf32>
    %37 = vector.broadcast %36 : vector<1x128xf32> to vector<32x128xf32>
    %38 = arith.mulf %26, %37 : vector<32x128xf32>
    %c0_29 = arith.constant 0 : index
    %c0_30 = arith.constant 0 : index
    %39 = vector.load %arg3[%c0_29, %c0_30] : memref<1x128xf32, #tpu.memory_space<vmem>>, vector<1x128xf32>
    %40 = vector.broadcast %39 : vector<1x128xf32> to vector<32x128xf32>
    %41 = arith.mulf %38, %40 : vector<32x128xf32>
    %c0_31 = arith.constant 0 : index
    %c0_32 = arith.constant 0 : index
    %42 = vector.load %arg4[%c0_31, %c0_32] : memref<1x128xf32, #tpu.memory_space<vmem>>, vector<1x128xf32>
    %43 = vector.broadcast %42 : vector<1x128xf32> to vector<32x128xf32>
    %44 = arith.addf %41, %43 : vector<32x128xf32>
    %cst_33 = arith.constant 0.000000e+00 : f32
    %45 = vector.broadcast %cst_33 : f32 to vector<32x128xf32>
    %46 = arith.maximumf %44, %45 : vector<32x128xf32>
    %47 = arith.truncf %46 : vector<32x128xf32> to vector<32x128xbf16>
    %48 = vector.shape_cast %47 : vector<32x128xbf16> to vector<2x16x128xbf16>
    %cst_34 = arith.constant 0.000000e+00 : f32
    %49 = vector.broadcast %cst_34 : f32 to vector<32x128xf32>
    %cst_35 = arith.constant 0.000000e+00 : bf16
    %50 = vector.broadcast %cst_35 : bf16 to vector<2x1x128xbf16>
    %51 = vector.extract_strided_slice %48 {offsets = [0, 0, 0], sizes = [2, 15, 128], strides = [1, 1, 1]} : vector<2x16x128xbf16> to vector<2x15x128xbf16>
    %52 = tpu.concatenate %50, %51 in 1 : vector<2x1x128xbf16>, vector<2x15x128xbf16> -> vector<2x16x128xbf16>
    %53 = vector.shape_cast %52 : vector<2x16x128xbf16> to vector<32x128xbf16>
    %c0_36 = arith.constant 0 : index
    %c0_37 = arith.constant 0 : index
    %c0_38 = arith.constant 0 : index
    %54 = vector.load %arg2[%c0_36, %c0_37, %c0_38] : memref<3x128x128xbf16, #tpu.memory_space<vmem>>, vector<1x128x128xbf16>
    %55 = vector.shape_cast %54 : vector<1x128x128xbf16> to vector<128x128xbf16>
    %cst_39 = arith.constant dense<0.000000e+00> : vector<32x128xf32>
    %56 = tpu.matmul %53, %55, %cst_39 {dimension_numbers = #tpu.dot_dimension_numbers<[1], [0], [0], [1], [0, 0, 1, 1], [], []>} : vector<32x128xbf16>, vector<128x128xbf16>, vector<32x128xf32> -> vector<32x128xf32>
    %57 = arith.addf %49, %56 : vector<32x128xf32>
    %58 = vector.shape_cast %48 : vector<2x16x128xbf16> to vector<32x128xbf16>
    %c1_40 = arith.constant 1 : index
    %c0_41 = arith.constant 0 : index
    %c0_42 = arith.constant 0 : index
    %59 = vector.load %arg2[%c1_40, %c0_41, %c0_42] : memref<3x128x128xbf16, #tpu.memory_space<vmem>>, vector<1x128x128xbf16>
    %60 = vector.shape_cast %59 : vector<1x128x128xbf16> to vector<128x128xbf16>
    %cst_43 = arith.constant dense<0.000000e+00> : vector<32x128xf32>
    %61 = tpu.matmul %58, %60, %cst_43 {dimension_numbers = #tpu.dot_dimension_numbers<[1], [0], [0], [1], [0, 0, 1, 1], [], []>} : vector<32x128xbf16>, vector<128x128xbf16>, vector<32x128xf32> -> vector<32x128xf32>
    %62 = arith.addf %57, %61 : vector<32x128xf32>
    %63 = vector.extract_strided_slice %48 {offsets = [0, 1, 0], sizes = [2, 15, 128], strides = [1, 1, 1]} : vector<2x16x128xbf16> to vector<2x15x128xbf16>
    %cst_44 = arith.constant 0.000000e+00 : bf16
    %64 = vector.broadcast %cst_44 : bf16 to vector<2x1x128xbf16>
    %65 = tpu.concatenate %63, %64 in 1 : vector<2x15x128xbf16>, vector<2x1x128xbf16> -> vector<2x16x128xbf16>
    %66 = vector.shape_cast %65 : vector<2x16x128xbf16> to vector<32x128xbf16>
    %c2_45 = arith.constant 2 : index
    %c0_46 = arith.constant 0 : index
    %c0_47 = arith.constant 0 : index
    %67 = vector.load %arg2[%c2_45, %c0_46, %c0_47] : memref<3x128x128xbf16, #tpu.memory_space<vmem>>, vector<1x128x128xbf16>
    %68 = vector.shape_cast %67 : vector<1x128x128xbf16> to vector<128x128xbf16>
    %cst_48 = arith.constant dense<0.000000e+00> : vector<32x128xf32>
    %69 = tpu.matmul %66, %68, %cst_48 {dimension_numbers = #tpu.dot_dimension_numbers<[1], [0], [0], [1], [0, 0, 1, 1], [], []>} : vector<32x128xbf16>, vector<128x128xbf16>, vector<32x128xf32> -> vector<32x128xf32>
    %70 = arith.addf %62, %69 : vector<32x128xf32>
    %cst_49 = arith.constant dense<0.000000e+00> : vector<128xf32>
    %71 = vector.multi_reduction <add>, %70, %cst_49 [0] : vector<32x128xf32> to vector<128xf32>
    %72 = vector.shape_cast %71 : vector<128xf32> to vector<1x128xf32>
    %c0_50 = arith.constant 0 : index
    %c0_51 = arith.constant 0 : index
    %73 = vector.load %arg5[%c0_50, %c0_51] : memref<128x128xf32, #tpu.memory_space<vmem>>, vector<128x128xf32>
    %cst_52 = arith.constant dense<0.000000e+00> : vector<1x128xf32>
    %74 = tpu.matmul %72, %73, %cst_52 {dimension_numbers = #tpu.dot_dimension_numbers<[1], [0], [0], [1], [0, 0, 1, 1], [], []>} : vector<1x128xf32>, vector<128x128xf32>, vector<1x128xf32> -> vector<1x128xf32>
    %cst_53 = arith.constant 0.001953125 : f32
    %75 = vector.broadcast %cst_53 : f32 to vector<1x128xf32>
    %76 = arith.mulf %74, %75 : vector<1x128xf32>
    %77 = vector.broadcast %76 : vector<1x128xf32> to vector<32x128xf32>
    %78 = arith.subf %70, %77 : vector<32x128xf32>
    %79 = arith.mulf %78, %78 : vector<32x128xf32>
    %cst_54 = arith.constant dense<0.000000e+00> : vector<128xf32>
    %80 = vector.multi_reduction <add>, %79, %cst_54 [0] : vector<32x128xf32> to vector<128xf32>
    %81 = vector.shape_cast %80 : vector<128xf32> to vector<1x128xf32>
    %c0_55 = arith.constant 0 : index
    %c0_56 = arith.constant 0 : index
    %82 = vector.load %arg5[%c0_55, %c0_56] : memref<128x128xf32, #tpu.memory_space<vmem>>, vector<128x128xf32>
    %cst_57 = arith.constant dense<0.000000e+00> : vector<1x128xf32>
    %83 = tpu.matmul %81, %82, %cst_57 {dimension_numbers = #tpu.dot_dimension_numbers<[1], [0], [0], [1], [0, 0, 1, 1], [], []>} : vector<1x128xf32>, vector<128x128xf32>, vector<1x128xf32> -> vector<1x128xf32>
    %cst_58 = arith.constant 0.001953125 : f32
    %84 = vector.broadcast %cst_58 : f32 to vector<1x128xf32>
    %85 = arith.mulf %83, %84 : vector<1x128xf32>
    %cst_59 = arith.constant 9.99999974E-6 : f32
    %86 = vector.broadcast %cst_59 : f32 to vector<1x128xf32>
    %87 = arith.addf %85, %86 : vector<1x128xf32>
    %88 = math.rsqrt %87 : vector<1x128xf32>
    %89 = vector.broadcast %88 : vector<1x128xf32> to vector<32x128xf32>
    %90 = arith.mulf %78, %89 : vector<32x128xf32>
    %c0_60 = arith.constant 0 : index
    %c0_61 = arith.constant 0 : index
    %91 = vector.load %arg3[%c0_60, %c0_61] : memref<1x128xf32, #tpu.memory_space<vmem>>, vector<1x128xf32>
    %92 = vector.broadcast %91 : vector<1x128xf32> to vector<32x128xf32>
    %93 = arith.mulf %90, %92 : vector<32x128xf32>
    %c0_62 = arith.constant 0 : index
    %c0_63 = arith.constant 0 : index
    %94 = vector.load %arg4[%c0_62, %c0_63] : memref<1x128xf32, #tpu.memory_space<vmem>>, vector<1x128xf32>
    %95 = vector.broadcast %94 : vector<1x128xf32> to vector<32x128xf32>
    %96 = arith.addf %93, %95 : vector<32x128xf32>
    %c0_64 = arith.constant 0 : index
    %c1_65 = arith.constant 1 : index
    %c0_66 = arith.constant 0 : index
    %97 = vector.load %arg0[%c0_64, %c1_65, %c0_66] : memref<2x18x64xbf16, #tpu.memory_space<vmem>>, vector<2x16x64xbf16>
    %98 = vector.shape_cast %97 : vector<2x16x64xbf16> to vector<32x64xbf16>
    %c0_67 = arith.constant 0 : index
    %c0_68 = arith.constant 0 : index
    %99 = vector.load %arg6[%c0_67, %c0_68] : memref<64x128xbf16, #tpu.memory_space<vmem>>, vector<64x128xbf16>
    %cst_69 = arith.constant dense<0.000000e+00> : vector<32x128xf32>
    %100 = tpu.matmul %98, %99, %cst_69 {dimension_numbers = #tpu.dot_dimension_numbers<[1], [0], [0], [1], [0, 0, 1, 1], [], []>} : vector<32x64xbf16>, vector<64x128xbf16>, vector<32x128xf32> -> vector<32x128xf32>
    %c0_70 = arith.constant 0 : index
    %c0_71 = arith.constant 0 : index
    %101 = vector.load %arg7[%c0_70, %c0_71] : memref<1x128xf32, #tpu.memory_space<vmem>>, vector<1x128xf32>
    %102 = vector.broadcast %101 : vector<1x128xf32> to vector<32x128xf32>
    %103 = arith.addf %100, %102 : vector<32x128xf32>
    %104 = arith.addf %103, %96 : vector<32x128xf32>
    %cst_72 = arith.constant 0.000000e+00 : f32
    %105 = vector.broadcast %cst_72 : f32 to vector<32x128xf32>
    %106 = arith.maximumf %104, %105 : vector<32x128xf32>
    %c0_73 = arith.constant 0 : index
    %c0_74 = arith.constant 0 : index
    %107 = vector.load %arg8[%c0_73, %c0_74] : memref<32x128xf32, #tpu.memory_space<vmem>>, vector<32x128xf32>
    tpu.vector_store %arg8[%c0_73, %c0_74], %106 {strides = array<i32>} : memref<32x128xf32, #tpu.memory_space<vmem>>, vector<32x128xf32>,
    return
  }
}

</mosaic_0001>

<bundles_post_ra>
// kernel: tpu_custom_call.1
= control target key start
LH: loop header
LB: loop body
LE: loop exit
PB: predicated region body
PF: predicated region fallthrough
CT: control target
= control target key end

     0   :  { %13 = vsyncpa [#allocation3], 0  ;;  %s1617_s0 = inlined_call_operand.vmem [shape: bf16[2,18,64], index: 0, kind: input, shape index: {}]   ;;  %s1618_s1 = inlined_call_operand.hbm [shape: bf16[3,64,128], index: 1, kind: input, shape index: {}]   ;;  %s1619_s2 = inlined_call_operand.hbm [shape: bf16[3,128,128], index: 2, kind: input, shape index: {}]   ;;  %s1620_s3 = inlined_call_operand.vmem [shape: f32[1,128], index: 3, kind: input, shape index: {}]   ;;  %s1621_s4 = inlined_call_operand.vmem [shape: f32[1,128], index: 4, kind: input, shape index: {}]   ;;  %s1622_s5 = inlined_call_operand.hbm [shape: f32[128,128], index: 5, kind: input, shape index: {}]   ;;  %s1623_s6 = inlined_call_operand.vmem [shape: bf16[64,128], index: 6, kind: input, shape index: {}]   ;;  %s1624_s7 = inlined_call_operand.vmem [shape: f32[1,128], index: 7, kind: input, shape index: {}]   ;;  %s1625_s8 = inlined_call_operand.hbm [shape: f32[32,128], index: 8, kind: output, shape index: {}]  }
   0x1   :  { %14 = vsyncpa [#allocation6], 0 }
   0x2   :  { %15 = vsyncpa [#allocation4], 0  ;;  %s35_s29 = sshll.u32 %s1619_s2, 4  ;;  %s1299_s30 = smov [#allocation5]   ;;  %s36_s29 = int_to_ptr.hbm [resolvable:$true] %s35_s29 }
   0x3   :  { %s37_s9 = sshll.u32 %s1299_s30, 4  ;;  %s22_s12 = sshll.u32 %s1618_s1, 4  ;;  %s38_s9 = int_to_ptr.vmem [resolvable:$true] %s37_s9  ;;  %s23_s12 = int_to_ptr.hbm [resolvable:$true] %s22_s12 }
   0x4   :  { %s1300_s13 = smov 64   ;;  %s1301_s14 = smov 4  }
   0x5   :  { %43 = dma.hbm_to_vmem [thread:$0]  %s36_s29, 3072, %s38_s9, [#allocation6], %s1300_s13, %s1300_s13, %s1301_s14  }
   0x6   :  { %s1302_s15 = smov [#allocation2]   ;;  %s52_s19 = sshll.u32 %s1622_s5, 4  ;;  %s53_s19 = int_to_ptr.hbm [resolvable:$true] %s52_s19 }
   0x7   :  { %s24_s16 = sshll.u32 %s1302_s15, 4  ;;  %s1303_s2 = smov [#allocation7]   ;;  %s25_s16 = int_to_ptr.vmem [resolvable:$true] %s24_s16 }
   0x8   :  { %30 = dma.hbm_to_vmem [thread:$0]  %s23_s12, 1536, %s25_s16, [#allocation3], %s1300_s13, %s1300_s13, %s1301_s14  }
   0x9   :  { %s54_s20 = sshll.u32 %s1303_s2, 4  ;;  %s1304_s21 = smov 128   ;;  %s55_s20 = int_to_ptr.vmem [resolvable:$true] %s54_s20 }
   0xa   :  { %s1305_s22 = smov 8  }
   0xb   :  { %60 = dma.hbm_to_vmem [thread:$0]  %s53_s19, 2048, %s55_s20, [#allocation6], %s1304_s21, %s1304_s21, %s1305_s22  }
   0xc   :  { %1293 = dma.done.wait [#allocation3], 1536  }
   0xd   :  { %1294 = vsyncadd [#allocation3], 4294965760 }
   0xe   :  { %1295 = dma.done.wait [#allocation6], 5120  }
   0xf   :  { %1296 = vsyncadd [#allocation6], 4294962176  ;;  %v1149_v0 = vld [vmem:[#allocation2 + $0x38] sm:$0xff]  ;;  %v1148_v3 = vld [vmem:[#allocation2 + $0x30] sm:$0xff]  ;;  %vm92_vm0 = vsmask.f32 3328 }
  0x10   :  { %v1145_v1 = vld [vmem:[#allocation2 + $0x18] sm:$0xff]  ;;  %193 = vmatpush.bf16.msra.mxu0 %v1149_v0  ;;  %v1144_v4 = vld [vmem:[#allocation2 + $0x10] sm:$0xff]  ;;  %vm93_vm1 = vsmask.f32 7440  ;;  %vm273_vm2 = vcmask 1042432   ;;  %vm274_vm3 = vcmask 1046532  }
  0x11   :  { %v1153_v2 = vld [vmem:[#allocation2 + $0x58] sm:$0xff]  ;;  %252 = vmatpush.bf16.msra.mxu1 %v1145_v1  ;;  %v1152_v5 = vld [vmem:[#allocation2 + $0x50] sm:$0xff]  ;;  %v78_v6 = vld [vmem:[%s1617_s0] sm:$0xf]  ;;  %vm182_vm6 = vcmask 523264   ;;  %vm509_vm10 = vcmask 1040384  }
  0x12   :  { %339 = vmatpush.bf16.msra.mxu2 %v1153_v2  ;;  %v79_v7 = vld [vmem:[%s1617_s0 + $0x4] sm:$0xf]  ;;  %v90_v8 = vld [vmem:[%s1617_s0 + $0x8] sm:$0x1]  ;;  %v96_v11 = vshrl.u32 %v78_v6, 16  ;;  %v99_v12 = vshll.u32 %v78_v6, 16  ;;  %vm1378_vm4 = vmor %vm273_vm2, %vm274_vm3 }
  0x13   :  { %v1147_v9 = vld [vmem:[#allocation2 + $0x28] sm:$0xff]  ;;  %v105_v13 = vshll.u32 %v79_v7, 16  ;;  %v109_v14 = vshrl.u32 %v79_v7, 16  ;;  %v115_v16 = vshll.u32 %v90_v8, 16  ;;  %v267_v17 = vld [vmem:[%s1617_s0] sm:$0xe]  ;;  %vm1390_vm5 = vmor %vm92_vm0, %vm93_vm1 }
  0x14   :  { %v1143_v10 = vld [vmem:[#allocation2 + $0x8] sm:$0xff]  ;;  %194 = vmatpush.bf16.msra.mxu0 %v1148_v3  ;;  %v278_v18 = vrot.slane %v79_v7, 5  ;;  %v281_v19 = vrot.slane %v90_v8, 5  ;;  %v98_v20 = vrot.slane %v96_v11, 4  ;;  %v101_v21 = vrot.slane %v99_v12, 5  ;;  %v1146_v31 = vld [vmem:[#allocation2 + $0x20] sm:$0xff] }
  0x15   :  { %253 = vmatpush.bf16.msra.mxu1 %v1144_v4  ;;  %v1151_v15 = vld [vmem:[#allocation2 + $0x48] sm:$0xff]  ;;  %v107_v22 = vrot.slane %v105_v13, 5  ;;  %v111_v23 = vrot.slane %v109_v14, 4  ;;  %v117_v26 = vrot.slane %v115_v16, 5  ;;  %v1006_v27 = vrot.slane %v267_v17, 9  ;;  %v1142_v32 = vld [vmem:[#allocation2] sm:$0xff] }
  0x16   :  { %340 = vmatpush.bf16.msra.mxu2 %v1152_v5  ;;  %v80_v25 = vld [vmem:[%s1617_s0 + $0xc] sm:$0xf]  ;;  %v280_v28 = vrot.slane %v278_v18, 4  ;;  %v81_v29 = vld [vmem:[%s1617_s0 + $0x10] sm:$0xf]  ;;  %v1150_v33 = vld [vmem:[#allocation2 + $0x40] sm:$0xff]  ;;  %v102_v34 = vor.u32 %v101_v21, %v98_v20 }
  0x17   :  { %v120_v30 = vshrl.u32 %v80_v25, 16  ;;  %v112_v35 = vor.u32 %v111_v23, %v107_v22  ;;  %v123_v36 = vshll.u32 %v80_v25, 16  ;;  %v129_v37 = vshll.u32 %v81_v29, 16  ;;  %v91_v47 = vld [vmem:[%s1617_s0 + $0x14] sm:$0x1]  ;;  %v1140_v53 = vld [vmem:[%s1617_s0] sm:$0xff] }
  0x18   :  { %195 = vmatpush.bf16.msra.mxu0 %v1147_v9  ;;  %v279_v39 = vsel %vm1378_vm4, %v1006_v27, %v278_v18  ;;  %v282_v40 = vsel %vm1378_vm4, %v280_v28, %v281_v19  ;;  %v133_v42 = vshrl.u32 %v81_v29, 16  ;;  %v103_v43 = vrot.slane %v102_v34, 4  ;;  %v268_v60 = vld [vmem:[%s1617_s0 + $0xc] sm:$0xe]  ;;  %v1434_v16 = vld [vmem:[#allocation7 + $0x78] sm:$0xff]  ;;  %v1438_v17 = vld [vmem:[#allocation7 + $0x70] sm:$0xff] }
  0x19   :  { %254 = vmatpush.bf16.msra.mxu1 %v1143_v10  ;;  %v122_v41 = vrot.slane %v120_v30, 4  ;;  %v113_v44 = vrot.slane %v112_v35, 4  ;;  %v299_v45 = vunpack.c.l.b16 %v279_v39  ;;  %v300_v46 = vunpack.c.l.b16 %v282_v40  ;;  %v1141_v13 = vld [vmem:[%s1617_s0 + $0xc] sm:$0xff]  ;;  %383 = vmatpush.msra.mxu3 %v1434_v16  ;;  %v1446_v19 = vld [vmem:[#allocation7 + $0x60] sm:$0xff]  ;;  %v1450_v20 = vld [vmem:[#allocation7 + $0x58] sm:$0xff]  ;;  %s948_s9 = sshll.u32 %s1625_s8, 4  ;;  %s949_s9 = int_to_ptr.hbm [resolvable:$true] %s948_s9 }
  0x1a   :  { %341 = vmatpush.bf16.msra.mxu2 %v1151_v15  ;;  %v125_v48 = vrot.slane %v123_v36, 5  ;;  %v131_v49 = vrot.slane %v129_v37, 5  ;;  %v135_v50 = vrot.slane %v133_v42, 4  ;;  %v108_v51 = vsel %vm1390_vm5, %v103_v43, %v107_v22  ;;  %v1440_v18 = vld [vmem:[#allocation7 + $0x68] sm:$0xff]  ;;  %v1454_v21 = vld [vmem:[#allocation7 + $0x50] sm:$0xff]  ;;  %v1462_v23 = vld [vmem:[#allocation7 + $0x40] sm:$0xff] }
  0x1b   :  { %v118_v52 = vsel %vm1390_vm5, %v113_v44, %v117_v26  ;;  %v152_v54 = vunpack.c.l.b16 %v108_v51  ;;  %v303_v56 = vpack.c.b16 %v300_v46, %v299_v45  ;;  %v139_v57 = vshll.u32 %v91_v47, 16  ;;  %384 = vmatpush.msra.mxu3 %v1438_v17  ;;  %v1456_v22 = vld [vmem:[#allocation7 + $0x48] sm:$0xff]  ;;  %v1466_v25 = vld [vmem:[#allocation7 + $0x38] sm:$0xff]  ;;  %v1470_v27 = vld [vmem:[#allocation7 + $0x30] sm:$0xff] }
  0x1c   :  { %196 = vmatpush.bf16.msra.mxu0 %v1146_v31  ;;  %v153_v55 = vunpack.c.l.b16 %v118_v52  ;;  %v126_v58 = vor.u32 %v125_v48, %v122_v41  ;;  %v136_v59 = vor.u32 %v135_v50, %v131_v49  ;;  %v285_v61 = vrot.slane %v81_v29, 5  ;;  %v1474_v28 = vld [vmem:[#allocation7 + $0x28] sm:$0xff]  ;;  %v1478_v29 = vld [vmem:[#allocation7 + $0x20] sm:$0xff]  ;;  %v1480_v30 = vld [vmem:[#allocation7 + $0x18] sm:$0xff] }
  0x1d   :  { %255 = vmatpush.bf16.msra.mxu1 %v1142_v32  ;;  %v141_v63 = vrot.slane %v139_v57, 5  ;;  %v1007_v0 = vrot.slane %v268_v60, 9  ;;  %v288_v4 = vrot.slane %v91_v47, 5  ;;  %385 = vmatpush.msra.mxu3 %v1440_v18  ;;  %v1488_v35 = vld [vmem:[#allocation7 + $0x8] sm:$0xff]  ;;  %v1492_v36 = vld [vmem:[#allocation7] sm:$0xff]  ;;  %vm689_vm12 = vcmask 1047552  }
  0x1e   :  { %342 = vmatpush.bf16.msra.mxu2 %v1150_v33  ;;  %v1411_v62 = vpack.c.b16 %v153_v55, %v152_v54  ;;  %v127_v1 = vrot.slane %v126_v58, 4  ;;  %v137_v2 = vrot.slane %v136_v59, 4  ;;  %v287_v3 = vrot.slane %v285_v61, 4  ;;  %v1484_v33 = vld [vmem:[#allocation7 + $0x10] sm:$0xff] }
  0x1f   :  { %v286_v7 = vsel %vm1378_vm4, %v1007_v0, %v285_v61  ;;  %386 = vmatpush.msra.mxu3 %v1446_v19  ;;  %vm510_vm11 = vsmask.f32 256  ;;  %vm690_vm13 = vsmask.f32 7424 }
  0x20   :  { %1004 = vmatmul.msk.bf16.vlgmr.msra.gmra.mxu1 %vm182_vm6, %v1140_v53  ;;  %978 = vmatmul.msk.bf16.vlgmr.msra.gmra.mxu0 %vm182_vm6, %v1411_v62  ;;  %v132_v5 = vsel %vm1390_vm5, %v127_v1, %v131_v49  ;;  %v142_v6 = vsel %vm1390_vm5, %v137_v2, %v141_v63  ;;  %v289_v8 = vsel %vm1378_vm4, %v287_v3, %v288_v4  ;;  %v301_v11 = vunpack.c.l.b16 %v286_v7  ;;  %vm1568_vm14 = vmand %vm509_vm10, %vm510_vm11 }
  0x21   :  { %1024 = vmatmul.msk.bf16.vlgmr.msra.gmra.mxu2 %vm182_vm6, %v303_v56  ;;  %v154_v9 = vunpack.c.l.b16 %v132_v5  ;;  %v155_v10 = vunpack.c.l.b16 %v142_v6  ;;  %v302_v12 = vunpack.c.l.b16 %v289_v8  ;;  %422 = vmatpush.msrb.mxu0 %v1434_v16  ;;  %vm1572_vm15 = vmand %vm689_vm12, %vm690_vm13 }
  0x22   :  { %387 = vmatpush.msra.mxu3 %v1450_v20 }
  0x23   :  { %v1428_v14 = vpack.c.b16 %v155_v10, %v154_v9  ;;  %v304_v15 = vpack.c.b16 %v302_v12, %v301_v11  ;;  %423 = vmatpush.msrb.mxu0 %v1438_v17 }
  0x24   :  { %388 = vmatpush.msra.mxu3 %v1454_v21 }
  0x25   :  { %424 = vmatpush.msrb.mxu0 %v1440_v18 }
  0x26   :  { %389 = vmatpush.msra.mxu3 %v1456_v22 }
  0x27   :  { %425 = vmatpush.msrb.mxu0 %v1446_v19 }
  0x28   :  { %390 = vmatpush.msra.mxu3 %v1462_v23 }
  0x29   :  { %426 = vmatpush.msrb.mxu0 %v1450_v20 }
  0x2a   :  { %391 = vmatpush.msra.mxu3 %v1466_v25 }
  0x2b   :  { %427 = vmatpush.msrb.mxu0 %v1454_v21 }
  0x2c   :  { %392 = vmatpush.msra.mxu3 %v1470_v27 }
  0x2d   :  { %428 = vmatpush.msrb.mxu0 %v1456_v22 }
  0x2e   :  { %393 = vmatpush.msra.mxu3 %v1474_v28 }
  0x2f   :  { %429 = vmatpush.msrb.mxu0 %v1462_v23 }
  0x30   :  { %1005 = vmatmul.msk.bf16.gmra.mxu1 %vm182_vm6, %v1141_v13  ;;  %979 = vmatmul.msk.bf16.gmra.mxu0 %vm182_vm6, %v1428_v14 }
  0x31   :  { %1025 = vmatmul.msk.bf16.gmra.mxu2 %vm182_vm6, %v304_v15  ;;  %430 = vmatpush.msrb.mxu0 %v1466_v25 }
  0x32   :  { %394 = vmatpush.msra.mxu3 %v1478_v29 }
  0x33   :  { %431 = vmatpush.msrb.mxu0 %v1470_v27 }
  0x34   :  { %395 = vmatpush.msra.mxu3 %v1480_v30 }
  0x35   :  { %432 = vmatpush.msrb.mxu0 %v1474_v28 }
  0x36   :  { %396 = vmatpush.msra.mxu3 %v1484_v33 }
  0x37   :  { %433 = vmatpush.msrb.mxu0 %v1478_v29 }
  0x38   :  { %397 = vmatpush.msra.mxu3 %v1488_v35 }
  0x39   :  { %434 = vmatpush.msrb.mxu0 %v1480_v30 }
  0x3a   :  { %398 = vmatpush.msra.mxu3 %v1492_v36 }
  0x3b   :  { %435 = vmatpush.msrb.mxu0 %v1484_v33 }
  0x3d   :  { %436 = vmatpush.msrb.mxu0 %v1488_v35 }
  0x3f   :  { %437 = vmatpush.msrb.mxu0 %v1492_v36 }
  0x41   :  { %791 = vmatpush.msra.mxu0 %v1434_v16 }
  0x43   :  { %792 = vmatpush.msra.mxu0 %v1438_v17 }
  0x45   :  { %793 = vmatpush.msra.mxu0 %v1440_v18 }
  0x47   :  { %794 = vmatpush.msra.mxu0 %v1446_v19 }
  0x49   :  { %795 = vmatpush.msra.mxu0 %v1450_v20 }
  0x4b   :  { %796 = vmatpush.msra.mxu0 %v1454_v21 }
  0x4d   :  { %797 = vmatpush.msra.mxu0 %v1456_v22 }
  0x4f   :  { %798 = vmatpush.msra.mxu0 %v1462_v23 }
  0x51   :  { %799 = vmatpush.msra.mxu0 %v1466_v25 }
  0x53   :  { %800 = vmatpush.msra.mxu0 %v1470_v27 }
  0x55   :  { %801 = vmatpush.msra.mxu0 %v1474_v28 }
  0x57   :  { %802 = vmatpush.msra.mxu0 %v1478_v29 }
  0x59   :  { %803 = vmatpush.msra.mxu0 %v1480_v30 }
  0x5b   :  { %804 = vmatpush.msra.mxu0 %v1484_v33 }
  0x5d   :  { %805 = vmatpush.msra.mxu0 %v1488_v35 }
  0x5f   :  { %806 = vmatpush.msra.mxu0 %v1492_v36 }
  0x9d   :  { %v257_v24 = vpop.f32.mrf.mxu1  ;;  %v198_v26 = vpop.f32.mrf.mxu0 }
  0x9e   :  { %v258_v41 = vadd.f32 %v257_v24, %v198_v26 }
  0xa4   :  { %v344_v31 = vpop.f32.mrf.mxu2 }
  0xa5   :  { %v259_v32 = vpop.f32.mrf.mxu1  ;;  %v200_v34 = vpop.f32.mrf.mxu0  ;;  %v354_v47 = vadd.f32 %v344_v31, %v258_v41  ;;  %v1176_v41 = vld [vmem:[#allocation5 + $0xb0] sm:$0xff] }
  0xa6   :  { %v260_v42 = vadd.f32 %v259_v32, %v200_v34  ;;  %v1169_v32 = vld [vmem:[#allocation5 + $0x78] sm:$0xff]  ;;  %v1168_v34 = vld [vmem:[#allocation5 + $0x70] sm:$0xff] }
  0xa7   :  { %597 = vmatpush.bf16.msrb.mxu1 %v1169_v32 }
  0xab   :  { %598 = vmatpush.bf16.msrb.mxu1 %v1168_v34 }
  0xac   :  { %v346_v37 = vpop.f32.mrf.mxu2 }
  0xad   :  { %v203_v38 = vpop.f32.mrf.mxu0  ;;  %v262_v39 = vpop.f32.mrf.mxu1  ;;  %v355_v44 = vadd.f32 %v346_v37, %v260_v42  ;;  %v1161_v37 = vld [vmem:[#allocation5 + $0x38] sm:$0xff]  ;;  %v1166_v42 = vld [vmem:[#allocation5 + $0x60] sm:$0xff] }
  0xae   :  { %v263_v43 = vadd.f32 %v262_v39, %v203_v38  ;;  %v1177_v38 = vld [vmem:[#allocation5 + $0xb8] sm:$0xff]  ;;  %v1167_v39 = vld [vmem:[#allocation5 + $0x68] sm:$0xff]  ;;  %664 = vmatpush.bf16.msrb.mxu2 %v1161_v37 }
  0xaf   :  { %v358_v49 = vadd.f32 %v355_v44, %v354_v47  ;;  %759 = vmatpush.bf16.msrb.mxu3 %v1177_v38  ;;  %599 = vmatpush.bf16.msrb.mxu1 %v1167_v39 }
  0xb3   :  { %760 = vmatpush.bf16.msrb.mxu3 %v1176_v41  ;;  %600 = vmatpush.bf16.msrb.mxu1 %v1166_v42 }
  0xb4   :  { %v349_v40 = vpop.f32.mrf.mxu2 }
  0xb5   :  { %v205_v45 = vpop.f32.mrf.mxu0  ;;  %v264_v46 = vpop.f32.mrf.mxu1  ;;  %v356_v48 = vadd.f32 %v349_v40, %v263_v43  ;;  %v1160_v40 = vld [vmem:[#allocation5 + $0x30] sm:$0xff]  ;;  %v1159_v43 = vld [vmem:[#allocation5 + $0x28] sm:$0xff] }
  0xb6   :  { %v265_v50 = vadd.f32 %v264_v46, %v205_v45  ;;  %665 = vmatpush.bf16.msrb.mxu2 %v1160_v40  ;;  %v1165_v45 = vld [vmem:[#allocation5 + $0x58] sm:$0xff]  ;;  %v1158_v46 = vld [vmem:[#allocation5 + $0x20] sm:$0xff] }
  0xb7   :  { %v359_v52 = vadd.f32 %v358_v49, %v356_v48  ;;  %601 = vmatpush.bf16.msrb.mxu1 %v1165_v45  ;;  %v1157_v49 = vld [vmem:[#allocation5 + $0x18] sm:$0xff] }
  0xba   :  { %666 = vmatpush.bf16.msrb.mxu2 %v1159_v43 }
  0xbc   :  { %v351_v51 = vpop.f32.mrf.mxu2 }
  0xbd   :  { %v357_v53 = vadd.f32 %v351_v51, %v265_v50  ;;  %v1173_v50 = vld [vmem:[#allocation5 + $0x98] sm:$0xff]  ;;  %v1163_v51 = vld [vmem:[#allocation5 + $0x48] sm:$0xff] }
  0xbe   :  { %667 = vmatpush.bf16.msrb.mxu2 %v1158_v46 }
  0xbf   :  { %v360_v54 = vadd.f32 %v359_v52, %v357_v53  ;;  %v1156_v52 = vld [vmem:[#allocation5 + $0x10] sm:$0xff] }
  0xc1   :  { %v361_v55 = vrot.slane %v360_v54, 4 }
  0xc2   :  { %668 = vmatpush.bf16.msrb.mxu2 %v1157_v49 }
  0xc3   :  { %v362_v56 = vadd.f32 %v361_v55, %v360_v54  ;;  %v1162_v55 = vld [vmem:[#allocation5 + $0x40] sm:$0xff] }
  0xc5   :  { %v363_v57 = vrot.slane %v362_v56, 2 }
  0xc6   :  { %669 = vmatpush.bf16.msrb.mxu2 %v1156_v52 }
  0xc7   :  { %v364_v58 = vadd.f32 %v363_v57, %v362_v56 }
  0xc9   :  { %v365_v59 = vrot.slane %v364_v58, 1 }
  0xcb   :  { %v366_v60 = vadd.f32 %v365_v59, %v364_v58  ;;  %v1155_v58 = vld [vmem:[#allocation5 + $0x8] sm:$0xff] }
  0xcc   :  { %v1171_v59 = vld [vmem:[#allocation5 + $0x88] sm:$0xff]  ;;  %670 = vmatpush.bf16.msrb.mxu2 %v1155_v58 }
  0xcd   :  { %399 = vmatmul.f32.vlgmr.msra.gmra.mxu3 %v366_v60  ;;  %v1154_v60 = vld [vmem:[#allocation5] sm:$0xff] }
  0xd0   :  { %671 = vmatpush.bf16.msrb.mxu2 %v1154_v60  ;;  %v1181_v60 = vld [vmem:[%s1623_s6 + $0x18] sm:$0xff] }
  0xd4   :  { %915 = vmatpush.bf16.msra.mxu2 %v1181_v60 }
 0x150   :  { %v400_v61 = vpop.f32.mrf.mxu3 }
 0x151   :  { %v403_v63 = vmul.f32 0.001953125, %v400_v61  ;;  %v1170_v61 = vld [vmem:[#allocation5 + $0x80] sm:$0xff] }
 0x153   :  { %v404_v0 = vperm.slane %v403_v63, 0 }
 0x155   :  { %v1514_v1 = vsub.f32 %v354_v47, %v404_v0  ;;  %v1516_v2 = vsub.f32 %v355_v44, %v404_v0  ;;  %v1518_v3 = vsub.f32 %v356_v48, %v404_v0  ;;  %v1520_v4 = vsub.f32 %v357_v53, %v404_v0  ;;  %v1175_v44 = vld [vmem:[#allocation5 + $0xa8] sm:$0xff]  ;;  %v1174_v47 = vld [vmem:[#allocation5 + $0xa0] sm:$0xff]  ;;  %v1164_v48 = vld [vmem:[#allocation5 + $0x50] sm:$0xff] }
 0x156   :  { %761 = vmatpush.bf16.msrb.mxu3 %v1175_v44  ;;  %602 = vmatpush.bf16.msrb.mxu1 %v1164_v48  ;;  %v1172_v53 = vld [vmem:[#allocation5 + $0x90] sm:$0xff] }
 0x157   :  { %v409_v5 = vmul.f32 %v1514_v1, %v1514_v1  ;;  %v410_v6 = vmul.f32 %v1516_v2, %v1516_v2  ;;  %v411_v7 = vmul.f32 %v1518_v3, %v1518_v3  ;;  %v412_v9 = vmul.f32 %v1520_v4, %v1520_v4 }
 0x159   :  { %v413_v8 = vadd.f32 %v410_v6, %v409_v5 }
 0x15a   :  { %762 = vmatpush.bf16.msrb.mxu3 %v1174_v47  ;;  %603 = vmatpush.bf16.msrb.mxu1 %v1163_v51 }
 0x15b   :  { %v414_v10 = vadd.f32 %v413_v8, %v411_v7 }
 0x15d   :  { %v415_v11 = vadd.f32 %v414_v10, %v412_v9 }
 0x15e   :  { %763 = vmatpush.bf16.msrb.mxu3 %v1173_v50  ;;  %604 = vmatpush.bf16.msrb.mxu1 %v1162_v55 }
 0x15f   :  { %v416_v12 = vrot.slane %v415_v11, 4 }
 0x161   :  { %v417_v13 = vadd.f32 %v416_v12, %v415_v11 }
 0x162   :  { %764 = vmatpush.bf16.msrb.mxu3 %v1172_v53  ;;  %830 = vmatpush.msra.mxu1 %v1434_v16 }
 0x163   :  { %v418_v15 = vrot.slane %v417_v13, 2 }
 0x164   :  { %831 = vmatpush.msra.mxu1 %v1438_v17 }
 0x165   :  { %v419_v24 = vadd.f32 %v418_v15, %v417_v13 }
 0x166   :  { %765 = vmatpush.bf16.msrb.mxu3 %v1171_v59  ;;  %832 = vmatpush.msra.mxu1 %v1440_v18 }
 0x167   :  { %v420_v26 = vrot.slane %v419_v24, 1 }
 0x168   :  { %833 = vmatpush.msra.mxu1 %v1446_v19  ;;  %v1542_v19 = vld [vmem:[%s1620_s3] ss:$0 sm:$0xff] }
 0x169   :  { %v421_v31 = vadd.f32 %v420_v26, %v419_v24 }
 0x16a   :  { %766 = vmatpush.bf16.msrb.mxu3 %v1170_v61  ;;  %834 = vmatpush.msra.mxu1 %v1450_v20 }
 0x16b   :  { %438 = vmatmul.f32.vlgmr.msrb.gmra.mxu0 %v421_v31 }
 0x16c   :  { %835 = vmatpush.msra.mxu1 %v1454_v21 }
 0x16e   :  { %836 = vmatpush.msra.mxu1 %v1456_v22  ;;  %v1550_v22 = vld [vmem:[%s1621_s4] ss:$0 sm:$0xff] }
 0x170   :  { %837 = vmatpush.msra.mxu1 %v1462_v23 }
 0x172   :  { %838 = vmatpush.msra.mxu1 %v1466_v25 }
 0x174   :  { %839 = vmatpush.msra.mxu1 %v1470_v27 }
 0x176   :  { %840 = vmatpush.msra.mxu1 %v1474_v28 }
 0x178   :  { %841 = vmatpush.msra.mxu1 %v1478_v29 }
 0x17a   :  { %842 = vmatpush.msra.mxu1 %v1480_v30 }
 0x17c   :  { %843 = vmatpush.msra.mxu1 %v1484_v33 }
 0x17e   :  { %844 = vmatpush.msra.mxu1 %v1488_v35 }
 0x180   :  { %845 = vmatpush.msra.mxu1 %v1492_v36 }
 0x1e8   :  { %v439_v54 = vpop.f32.mrf.mxu0 }
 0x1e9   :  { %v442_v56 = vmul.f32 0.001953125, %v439_v54 }
 0x1eb   :  { %v443_v57 = vadd.f32 1e-05, %v442_v56 }
 0x1ed   :  { %1193 = vrsqrt.f32 %v443_v57  ;;  %vm450_vm8 = vweird.f32 %v443_v57 }
 0x1f3   :  { %v1194_v63 = vpop.eup %1193 }
 0x1f4   :  { %v445_v0 = vmul.f32 %v1194_v63, %v443_v57  ;;  %vm451_vm7 = vweird.f32 %v1194_v63 }
 0x1f5   :  { %vm452_vm9 = vmor %vm450_vm8, %vm451_vm7 }
 0x1f6   :  { %v446_v5 = vmul.f32 %v1194_v63, %v445_v0 }
 0x1f8   :  { %v447_v6 = vmul.f32 0.5, %v446_v5 }
 0x1fa   :  { %v448_v16 = vsub.f32 1.5, %v447_v6 }
 0x1fc   :  { %v449_v7 = vmul.f32 %v1194_v63, %v448_v16 }
 0x1fe   :  { %v453_v17 = vsel %vm452_vm9, %v1194_v63, %v449_v7 }
 0x1ff   :  { %v454_v18 = vperm.slane %v453_v17, 0 }
 0x201   :  { %v455_v20 = vmul.f32 %v454_v18, %v1514_v1  ;;  %v456_v21 = vmul.f32 %v454_v18, %v1516_v2  ;;  %v457_v23 = vmul.f32 %v454_v18, %v1518_v3  ;;  %v458_v25 = vmul.f32 %v454_v18, %v1520_v4 }
 0x203   :  { %v463_v8 = vmul.f32 %v1542_v19, %v455_v20  ;;  %v464_v9 = vmul.f32 %v1542_v19, %v456_v21  ;;  %v465_v27 = vmul.f32 %v1542_v19, %v457_v23  ;;  %v466_v1 = vmul.f32 %v1542_v19, %v458_v25 }
 0x205   :  { %v471_v2 = vadd.f32 %v1550_v22, %v463_v8  ;;  %v472_v10 = vadd.f32 %v1550_v22, %v464_v9  ;;  %v473_v3 = vadd.f32 %v1550_v22, %v465_v27  ;;  %v474_v4 = vadd.f32 %v1550_v22, %v466_v1 }
 0x207   :  { %v475_v28 = vmax.f32 %v471_v2, 0.0  ;;  %v476_v11 = vmax.f32 %v472_v10, 0.0  ;;  %v477_v15 = vmax.f32 %v473_v3, 0.0  ;;  %v478_v24 = vmax.f32 %v474_v4, 0.0 }
 0x209   :  { %v479_v12 = vpack.c.bf16 %v475_v28, %v475_v28  ;;  %v480_v13 = vpack.c.bf16 %v476_v11, %v476_v11  ;;  %v481_v32 = vpack.c.bf16 %v477_v15, %v477_v15  ;;  %v482_v34 = vpack.c.bf16 %v478_v24, %v478_v24  ;;  %v1178_v15 = vld [vmem:[%s1623_s6] sm:$0xff] }
 0x20b   :  { %v487_v29 = vunpack.c.l.b16 %v479_v12  ;;  %v488_v26 = vunpack.c.l.b16 %v480_v13  ;;  %v489_v39 = vunpack.c.l.b16 %v481_v32  ;;  %v490_v40 = vunpack.c.l.b16 %v482_v34  ;;  %v1180_v12 = vld [vmem:[%s1623_s6 + $0x10] sm:$0xff]  ;;  %v1179_v13 = vld [vmem:[%s1623_s6 + $0x8] sm:$0xff] }
 0x20c   :  { %916 = vmatpush.bf16.msra.mxu2 %v1180_v12 }
 0x20d   :  { %v491_v31 = vpack.c.b16 %v488_v26, %v487_v29  ;;  %v492_v45 = vpack.c.b16 %v490_v40, %v489_v39 }
 0x20f   :  { %605 = vmatmul.bf16.vlgmr.msrb.gmra.mxu1 %v491_v31  ;;  %v494_v30 = vshrl.u32 %v491_v31, 16  ;;  %v497_v37 = vshll.u32 %v491_v31, 16  ;;  %v501_v46 = vshrl.u32 %v492_v45, 16  ;;  %v504_v47 = vshll.u32 %v492_v45, 16 }
 0x210   :  { %917 = vmatpush.bf16.msra.mxu2 %v1179_v13 }
 0x211   :  { %v496_v33 = vrot.slane %v494_v30, 7  ;;  %v683_v35 = vrot.slane %v497_v37, 1  ;;  %v503_v48 = vrot.slane %v501_v46, 7  ;;  %v685_v49 = vrot.slane %v504_v47, 1 }
 0x213   :  { %v499_v41 = vor.u32 %v497_v37, %v496_v33  ;;  %v684_v42 = vor.u32 %v683_v35, %v494_v30  ;;  %v506_v50 = vor.u32 %v504_v47, %v503_v48  ;;  %v686_v51 = vor.u32 %v685_v49, %v501_v46 }
 0x214   :  { %918 = vmatpush.bf16.msra.mxu2 %v1178_v15 }
 0x215   :  { %v512_v43 = vsel %vm1568_vm14, 0, %v499_v41  ;;  %v692_v44 = vsel %vm1572_vm15, %v684_v42, 0  ;;  %v513_v52 = vsel %vm1568_vm14, 0, %v506_v50  ;;  %v693_v53 = vsel %vm1572_vm15, %v686_v51, 0 }
 0x216   :  { %672 = vmatmul.bf16.vlgmr.msrb.gmra.mxu2 %v512_v43  ;;  %767 = vmatmul.bf16.vlgmr.msrb.gmra.mxu3 %v692_v44 }
 0x21f   :  { %610 = vmatmul.bf16.gmra.mxu1 %v492_v45 }
 0x226   :  { %677 = vmatmul.bf16.gmra.mxu2 %v513_v52  ;;  %772 = vmatmul.bf16.gmra.mxu3 %v693_v53 }
 0x236   :  { %1138 = vmatmul.msk.bf16.vlgmr.msra.gmra.mxu2 %vm182_vm6, %v1411_v62 }
 0x246   :  { %1139 = vmatmul.msk.bf16.gmra.mxu2 %vm182_vm6, %v1428_v14 }
 0x28c   :  { %v606_v54 = vpop.f32.mrf.mxu1 }
 0x294   :  { %v608_v57 = vpop.f32.mrf.mxu1 }
 0x299   :  { %v673_v55 = vpop.f32.mrf.mxu2  ;;  %v768_v56 = vpop.f32.mrf.mxu3 }
 0x29a   :  { %v674_v6 = vadd.f32 %v673_v55, %v606_v54 }
 0x29c   :  { %v611_v61 = vpop.f32.mrf.mxu1  ;;  %v778_v17 = vadd.f32 %v768_v56, %v674_v6 }
 0x2a1   :  { %v675_v58 = vpop.f32.mrf.mxu2  ;;  %v770_v59 = vpop.f32.mrf.mxu3 }
 0x2a2   :  { %v676_v5 = vadd.f32 %v675_v58, %v608_v57 }
 0x2a4   :  { %v779_v7 = vadd.f32 %v770_v59, %v676_v5  ;;  %v613_v20 = vpop.f32.mrf.mxu1  ;;  %v1192_v59 = vld [vmem:[%s1624_s7] ss:$0 sm:$0xff]  ;;  %s1306_s7 = smov [#allocation8]  }
 0x2a5   :  { %s946_s28 = sshll.u32 %s1306_s7, 4  ;;  %s947_s28 = int_to_ptr.vmem [resolvable:$true] %s946_s28 }
 0x2a6   :  { %v782_v23 = vadd.f32 %v779_v7, %v778_v17 }
 0x2a9   :  { %v678_v63 = vpop.f32.mrf.mxu2  ;;  %v773_v0 = vpop.f32.mrf.mxu3 }
 0x2aa   :  { %v679_v16 = vadd.f32 %v678_v63, %v611_v61 }
 0x2ac   :  { %v780_v18 = vadd.f32 %v773_v0, %v679_v16 }
 0x2ae   :  { %v783_v9 = vadd.f32 %v782_v23, %v780_v18 }
 0x2b1   :  { %v680_v21 = vpop.f32.mrf.mxu2  ;;  %v775_v8 = vpop.f32.mrf.mxu3 }
 0x2b2   :  { %v681_v25 = vadd.f32 %v680_v21, %v613_v20 }
 0x2b4   :  { %v781_v27 = vadd.f32 %v775_v8, %v681_v25 }
 0x2b6   :  { %v784_v1 = vadd.f32 %v783_v9, %v781_v27 }
 0x2b8   :  { %v785_v2 = vrot.slane %v784_v1, 4 }
 0x2b9   :  { %v920_v14 = vpop.f32.mrf.mxu2 }
 0x2ba   :  { %v786_v10 = vadd.f32 %v785_v2, %v784_v1 }
 0x2bc   :  { %v787_v3 = vrot.slane %v786_v10, 2 }
 0x2be   :  { %v788_v4 = vadd.f32 %v787_v3, %v786_v10 }
 0x2c0   :  { %v789_v28 = vrot.slane %v788_v4, 1 }
 0x2c1   :  { %v922_v49 = vpop.f32.mrf.mxu2 }
 0x2c2   :  { %v790_v11 = vadd.f32 %v789_v28, %v788_v4  ;;  %v923_v20 = vadd.f32 %v1192_v59, %v922_v49 }
 0x2c4   :  { %807 = vmatmul.f32.vlgmr.msra.gmra.mxu0 %v790_v11 }
 0x2c9   :  { %v925_v53 = vpop.f32.mrf.mxu2 }
 0x2ca   :  { %v926_v21 = vadd.f32 %v1192_v59, %v925_v53 }
 0x2d1   :  { %v927_v5 = vpop.f32.mrf.mxu2 }
 0x2d2   :  { %v928_v23 = vadd.f32 %v1192_v59, %v927_v5 }
 0x341   :  { %v808_v24 = vpop.f32.mrf.mxu0 }
 0x342   :  { %v811_v29 = vmul.f32 0.001953125, %v808_v24 }
 0x344   :  { %v812_v26 = vperm.slane %v811_v29, 0 }
 0x346   :  { %v813_v31 = vsub.f32 %v778_v17, %v812_v26  ;;  %v814_v32 = vsub.f32 %v779_v7, %v812_v26  ;;  %v815_v34 = vsub.f32 %v780_v18, %v812_v26  ;;  %v816_v30 = vsub.f32 %v781_v27, %v812_v26 }
 0x347   :  { %v921_v18 = vadd.f32 %v1192_v59, %v920_v14 }
 0x348   :  { %v817_v37 = vmul.f32 %v813_v31, %v813_v31  ;;  %v818_v33 = vmul.f32 %v814_v32, %v814_v32  ;;  %v819_v38 = vmul.f32 %v815_v34, %v815_v34  ;;  %v820_v39 = vmul.f32 %v816_v30, %v816_v30 }
 0x34a   :  { %v821_v35 = vadd.f32 %v818_v33, %v817_v37 }
 0x34c   :  { %v822_v40 = vadd.f32 %v821_v35, %v819_v38 }
 0x34e   :  { %v823_v36 = vadd.f32 %v822_v40, %v820_v39 }
 0x350   :  { %v824_v41 = vrot.slane %v823_v36, 4 }
 0x352   :  { %v825_v42 = vadd.f32 %v824_v41, %v823_v36 }
 0x354   :  { %v826_v62 = vrot.slane %v825_v42, 2 }
 0x356   :  { %v827_v43 = vadd.f32 %v826_v62, %v825_v42 }
 0x358   :  { %v828_v44 = vrot.slane %v827_v43, 1 }
 0x35a   :  { %v829_v45 = vadd.f32 %v828_v44, %v827_v43 }
 0x35c   :  { %846 = vmatmul.f32.vlgmr.msra.gmra.mxu1 %v829_v45 }
 0x3d9   :  { %v847_v46 = vpop.f32.mrf.mxu1 }
 0x3da   :  { %v850_v47 = vmul.f32 0.001953125, %v847_v46 }
 0x3dc   :  { %v851_v48 = vadd.f32 1e-05, %v850_v47 }
 0x3de   :  { %1195 = vrsqrt.f32 %v851_v48  ;;  %vm858_vm1 = vweird.f32 %v851_v48 }
 0x3e4   :  { %v1196_v50 = vpop.eup %1195 }
 0x3e5   :  { %v853_v51 = vmul.f32 %v1196_v50, %v851_v48  ;;  %vm859_vm0 = vweird.f32 %v1196_v50 }
 0x3e6   :  { %vm860_vm2 = vmor %vm858_vm1, %vm859_vm0 }
 0x3e7   :  { %v854_v52 = vmul.f32 %v1196_v50, %v853_v51 }
 0x3e9   :  { %v855_v54 = vmul.f32 0.5, %v854_v52 }
 0x3eb   :  { %v856_v55 = vsub.f32 1.5, %v855_v54 }
 0x3ed   :  { %v857_v56 = vmul.f32 %v1196_v50, %v856_v55 }
 0x3ef   :  { %v861_v57 = vsel %vm860_vm2, %v1196_v50, %v857_v56 }
 0x3f0   :  { %v862_v58 = vperm.slane %v861_v57, 0 }
 0x3f2   :  { %v863_v60 = vmul.f32 %v862_v58, %v813_v31  ;;  %v864_v61 = vmul.f32 %v862_v58, %v814_v32  ;;  %v865_v63 = vmul.f32 %v862_v58, %v815_v34  ;;  %v866_v0 = vmul.f32 %v862_v58, %v816_v30 }
 0x3f4   :  { %v868_v6 = vmul.f32 %v1542_v19, %v864_v61  ;;  %v869_v16 = vmul.f32 %v1542_v19, %v865_v63  ;;  %v870_v7 = vmul.f32 %v1542_v19, %v866_v0  ;;  %v867_v17 = vmul.f32 %v1542_v19, %v863_v60 }
 0x3f6   :  { %v872_v25 = vadd.f32 %v1550_v22, %v868_v6  ;;  %v873_v8 = vadd.f32 %v1550_v22, %v869_v16  ;;  %v874_v9 = vadd.f32 %v1550_v22, %v870_v7  ;;  %v871_v27 = vadd.f32 %v1550_v22, %v867_v17 }
 0x3f8   :  { %v931_v1 = vadd.f32 %v923_v20, %v872_v25  ;;  %v932_v2 = vadd.f32 %v926_v21, %v873_v8  ;;  %v933_v10 = vadd.f32 %v928_v23, %v874_v9  ;;  %v930_v3 = vadd.f32 %v921_v18, %v871_v27 }
 0x3fa   :  { %v935_v4 = vmax.f32 %v931_v1, 0.0  ;;  %v936_v28 = vmax.f32 %v932_v2, 0.0  ;;  %v937_v11 = vmax.f32 %v933_v10, 0.0  ;;  %v934_v19 = vmax.f32 %v930_v3, 0.0 }
 0x3fc   :  { %939 = vst [vmem:[#allocation8 + $0x8] sm:$0xff] %v935_v4 }
 0x3fd   :  { %940 = vst [vmem:[#allocation8 + $0x10] sm:$0xff] %v936_v28 }
 0x3fe   :  { %941 = vst [vmem:[#allocation8 + $0x18] sm:$0xff] %v937_v11 }
 0x3ff   :  { %938 = vst [vmem:[#allocation8] sm:$0xff] %v934_v19 }
 0x400   :  { %954 = dma.vmem_to_hbm [thread:$0]  %s947_s28, 512, %s949_s9, [#allocation4], %s1304_s21, %s1304_s21, %s1305_s22  }
 0x401   :  { %1297 = dma.done.wait [#allocation4], 512  }
 0x402   :  { %1298 = vsyncadd [#allocation4], 4294966784 }
 0x403   :  { %959 = vsyncpa [#allocation3], 1 }
 0x404   :  { %960 = vsyncpa [#allocation6], 1 }
 0x405   :  { %961 = vsyncpa [#allocation4], 1 }

</bundles_post_ra>
